<compile_context>
chip_gen: v5e
topology: v5e:2x2
jax: 0.10.0
libtpu: 0.0.40
codegen_flags: <defaults>
</compile_context>

<pallas_src>
import jax
import jax.numpy as jnp
from jax import lax
from jax.experimental import pallas as pl
from jax.experimental.pallas import tpu as pltpu


def _round_up(x: int, m: int) -> int:
    return ((x + m - 1) // m) * m


def _vmem_capacity_bytes() -> int:
    """Per-core VMEM capacity; conservative fallback = v7x's 64 MiB."""
    try:
        return int(pltpu.get_tpu_info().vmem_capacity_bytes)
    except Exception:
        return 64 * 1024 * 1024


def _pick_batch_tile(batch: int, dim: int, per_buffer_bytes: int) -> int:
    """Batch tile: multiple of 128, sized by a lane-padding-aware VMEM budget,
    and capped so the grid has >= 2 steps whenever the batch allows it."""
    # f32 lane padding: each row of a (tb, D) block occupies round_up(D,128)*4
    # bytes in VMEM regardless of D.
    row_bytes = _round_up(dim, 128) * 4
    rows_by_vmem = max(128, (per_buffer_bytes // row_bytes) // 128 * 128)
    # Keep at least 2 grid steps when B > 128 so both v7x TensorCores get
    # tiles under dimension_semantics=("parallel",).
    rows_by_split = max(128, _round_up(pl.cdiv(batch, 2), 128))
    return min(rows_by_vmem, rows_by_split)


def _linear_kernel(x_ref, w_ref, b_ref, o_ref):
    # x_ref: (TB, D) VMEM, native dtype (streamed, double-buffered)
    # w_ref: (1, D)  VMEM, f32 (resident across grid steps)
    # b_ref: (1, 1)  SMEM scalar
    # o_ref: (1, TB) VMEM, f32 -- lane-dense output row (full-lane stores)
    x = x_ref[...].astype(jnp.float32)          # in-kernel cast: free filler under DMA
    acc = lax.dot_general(                      # (1,D) . (TB,D)^T over D -> (1,TB) on MXU
        w_ref[...], x,
        dimension_numbers=(((1,), (1,)), ((), ())),
        preferred_element_type=jnp.float32,
        precision=lax.Precision.HIGHEST)
    o_ref[...] = acc + b_ref[0, 0]


def linear_regression_forward(x, weight, bias):
    """Forward pass of nn.Linear(input_dim, 1).

    x:      [B, D] (any float dtype -- streamed as-is, cast in-kernel)
    weight: [1, D] (PyTorch layout, no host-side transpose)
    bias:   [1]
    returns [B, 1] float32
    """
    B, D = x.shape
    w_row = weight.reshape(1, D).astype(jnp.float32)   # tiny, VMEM-resident
    b = bias.reshape(1, 1).astype(jnp.float32)

    # Generation-aware VMEM budget: ~48 MiB limit / 8 MiB per buffer on v7x
    # (64 MiB physical), ~96 MiB / 12 MiB on v5e/v6e (128 MiB physical).
    vmem_limit = min(_vmem_capacity_bytes() * 3 // 4, 96 * 1024 * 1024)
    per_buffer = max(2 * 1024 * 1024, min(12 * 1024 * 1024, vmem_limit // 6))
    tb = _pick_batch_tile(B, D, per_buffer)

    grid = (pl.cdiv(B, tb),)                           # ragged last block, no padding

    out_row = pl.pallas_call(
        _linear_kernel,
        out_shape=jax.ShapeDtypeStruct((1, B), jnp.float32),
        grid=grid,
        in_specs=[
            pl.BlockSpec((tb, D), lambda i: (i, 0)),               # x: streamed per tile
            pl.BlockSpec((1, D), lambda i: (0, 0)),                # weight: resident
            pl.BlockSpec(memory_space=pltpu.MemorySpace.SMEM),     # bias: SMEM scalar
        ],
        out_specs=pl.BlockSpec((1, tb), lambda i: (0, i)),         # lane-dense output row
        compiler_params=pltpu.CompilerParams(
            dimension_semantics=("parallel",),                     # megacore on v7x
            vmem_limit_bytes=int(vmem_limit),
        ),
    )(x, w_row, b)

    # Back to the PyTorch output layout in the wrapper (layout plumbing only).
    return out_row.reshape(B, 1)


if __name__ == "__main__":
    batch, input_dim = 8, 32

    key = jax.random.PRNGKey(0)
    kx, kw, kb, kx2, kx3 = jax.random.split(key, 5)

    x = jax.random.normal(kx, (batch, input_dim), dtype=jnp.float32)

    # Deterministic init mimicking nn.Linear default: U[-1/sqrt(fan_in), +].
    bound = float(input_dim) ** -0.5
    weight = jax.random.uniform(kw, (1, input_dim), jnp.float32, -bound, bound)
    bias = jax.random.uniform(kb, (1,), jnp.float32, -bound, bound)

    def ref(xv):  # pure-VPU f32 reference (no MXU precision ambiguity)
        return jnp.sum(xv.astype(jnp.float32) * weight, axis=-1, keepdims=True) + bias

    # Small case: single (ragged) 128-row tile.
    y = jax.block_until_ready(linear_regression_forward(x, weight, bias))
    assert y.shape == (batch, 1)
    assert jnp.allclose(y, ref(x), atol=1e-4, rtol=1e-4), "mismatch (small)"

    # Multi-step grid with a ragged final tile (260 rows -> tb=256, 2 steps).
    x2 = jax.random.normal(kx2, (260, input_dim), dtype=jnp.float32)
    y2 = jax.block_until_ready(linear_regression_forward(x2, weight, bias))
    assert y2.shape == (260, 1)
    assert jnp.allclose(y2, ref(x2), atol=1e-4, rtol=1e-4), "mismatch (tiled)"

    # Native bf16 input streamed without any wrapper-side cast (cast in-kernel).
    x3 = jax.random.normal(kx3, (130, input_dim), dtype=jnp.float32).astype(jnp.bfloat16)
    y3 = jax.block_until_ready(linear_regression_forward(x3, weight, bias))
    assert y3.shape == (130, 1)
    assert jnp.allclose(y3, ref(x3), atol=1e-4, rtol=1e-4), "mismatch (bf16)"

    print("KERNEL_OK")
</pallas_src>

<mosaic_0001>
module attributes {stable_mosaic.version = 11 : i64} {
  func.func @_linear_kernel(%arg0: i32, %arg1: memref<128x32xf32, #tpu.memory_space<vmem>>, %arg2: memref<1x32xf32, #tpu.memory_space<vmem>>, %arg3: memref<1x1xf32, #tpu.memory_space<smem>>, %arg4: memref<1x128xf32, #tpu.memory_space<vmem>>) attributes {dimension_semantics = [#tpu.dimension_semantics<parallel>], iteration_bounds = array<i64: 1>, scalar_prefetch = 0 : i64, scratch_operands = 0 : i64, tpu.core_type = #tpu.core_type<tc>, window_params = [{transform_indices = @transform_0, window_bounds = array<i64: 128, 32>}, {pipeline_mode = #tpu.pipeline_mode<synchronous>, transform_indices = @transform_1, window_bounds = array<i64: 1, 32>}, {transform_indices = @transform_2, window_bounds = array<i64: 1, 1>}, {transform_indices = @transform_3, window_bounds = array<i64: 1, 128>}]} {
    %c0 = arith.constant 0 : index
    %c0_0 = arith.constant 0 : index
    %0 = vector.load %arg1[%c0, %c0_0] : memref<128x32xf32, #tpu.memory_space<vmem>>, vector<128x32xf32>
    %c0_1 = arith.constant 0 : index
    %c0_2 = arith.constant 0 : index
    %1 = vector.load %arg2[%c0_1, %c0_2] : memref<1x32xf32, #tpu.memory_space<vmem>>, vector<1x32xf32>
    %cst = arith.constant dense<0.000000e+00> : vector<1x128xf32>
    %2 = tpu.matmul %1, %0, %cst {dimension_numbers = #tpu.dot_dimension_numbers<[1], [1], [0], [0], [0, 0, 1, 0], [], []>, precision = #tpu.contract_precision<fp32>} : vector<1x32xf32>, vector<128x32xf32>, vector<1x128xf32> -> vector<1x128xf32>
    %c0_3 = arith.constant 0 : index
    %c0_4 = arith.constant 0 : index
    %3 = memref.load %arg3[%c0_3, %c0_4] : memref<1x1xf32, #tpu.memory_space<smem>>
    %4 = vector.broadcast %3 : f32 to vector<1x128xf32>
    %5 = arith.addf %2, %4 : vector<1x128xf32>
    %c0_5 = arith.constant 0 : index
    %c0_6 = arith.constant 0 : index
    %6 = vector.load %arg4[%c0_5, %c0_6] : memref<1x128xf32, #tpu.memory_space<vmem>>, vector<1x128xf32>
    tpu.vector_store %arg4[%c0_5, %c0_6], %5 {strides = array<i32>} : memref<1x128xf32, #tpu.memory_space<vmem>>, vector<1x128xf32>,
    return
  }
  func.func @transform_0(%arg0: i32) -> (i32, i32) {
    %c0_i32 = arith.constant 0 : i32
    %c0_i32_0 = arith.constant 0 : i32
    return %arg0, %c0_i32 : i32, i32
  }
  func.func @transform_1(%arg0: i32) -> (i32, i32) {
    %c0_i32 = arith.constant 0 : i32
    %c0_i32_0 = arith.constant 0 : i32
    %c0_i32_1 = arith.constant 0 : i32
    return %c0_i32, %c0_i32_0 : i32, i32
  }
  func.func @transform_2(%arg0: i32) -> (i32, i32) {
    %c0_i32 = arith.constant 0 : i32
    %c0_i32_0 = arith.constant 0 : i32
    %c0_i32_1 = arith.constant 0 : i32
    return %c0_i32, %c0_i32_0 : i32, i32
  }
  func.func @transform_3(%arg0: i32) -> (i32, i32) {
    %c0_i32 = arith.constant 0 : i32
    %c0_i32_0 = arith.constant 0 : i32
    return %c0_i32, %arg0 : i32, i32
  }
}

</mosaic_0001>

<bundles_post_ra>
// kernel: tpu_custom_call.1
= control target key start
LH: loop header
LB: loop body
LE: loop exit
PB: predicated region body
PF: predicated region fallthrough
CT: control target
= control target key end

     0   :  { %9 = vsyncpa [#allocation4], 0  ;;  %s798_s0 = inlined_call_operand.hbm [shape: f32[8,32], index: 0, kind: input, shape index: {}]   ;;  %s799_s1 = inlined_call_operand.vmem [shape: f32[1,32], index: 1, kind: input, shape index: {}]   ;;  %s800_s2 = inlined_call_operand.<no memory space> [shape: f32[1,1], index: 2, kind: input, shape index: {}]   ;;  %s801_s3 = inlined_call_operand.hbm [shape: f32[1,8], index: 3, kind: output, shape index: {}]  }
   0x1   :  { %10 = vsyncpa [#allocation5], 0 }
   0x2   :  { %14 = vsyncadd [#allocation4], 1920  ;;  %s15_s14 = sshll.u32 %s798_s0, 4  ;;  %s518_s15 = smov [#allocation3]   ;;  %s16_s14 = int_to_ptr.hbm [resolvable:$true] %s15_s14 }
   0x3   :  { %s17_s16 = sshll.u32 %s518_s15, 4  ;;  %s519_s17 = smov 128   ;;  %s18_s16 = int_to_ptr.vmem [resolvable:$true] %s17_s16 }
   0x4   :  { %s520_s18 = smov 8  }
   0x5   :  { %23 = dma.hbm_to_vmem [thread:$0]  %s16_s14, 128, %s18_s16, [#allocation4], %s519_s17, %s519_s17, %s520_s18  }
   0x6   :  { %514 = dma.done.wait [#allocation4], 2048  }
   0x7   :  { %515 = vsyncadd [#allocation4], 4294965248  ;;  %vm51_vm0 = vcmask 261120   ;;  %v47_v0 = vld [vmem:[#allocation3 + $0x78] sm:$0xff]  ;;  %v46_v1 = vld [vmem:[#allocation3 + $0x70] sm:$0xff]  ;;  %s521_s21 = smov [#allocation6]  }
   0x8   :  { %v45_v2 = vld [vmem:[#allocation3 + $0x68] sm:$0xff]  ;;  %v101_v3 = vsel %vm51_vm0, %v47_v0, 0  ;;  %v98_v4 = vsel %vm51_vm0, %v46_v1, 0  ;;  %v44_v6 = vld [vmem:[#allocation3 + $0x60] sm:$0xff]  ;;  %v43_v7 = vld [vmem:[#allocation3 + $0x58] sm:$0xff]  ;;  %s450_s22 = sshll.u32 %s521_s21, 4  ;;  %s451_s22 = int_to_ptr.vmem [resolvable:$true] %s450_s22 }
   0x9   :  { %v95_v5 = vsel %vm51_vm0, %v45_v2, 0  ;;  %v548_v8 = vand.u32 4294901760, %v101_v3  ;;  %v550_v9 = vand.u32 4294901760, %v98_v4  ;;  %v92_v11 = vsel %vm51_vm0, %v44_v6, 0  ;;  %v42_v17 = vld [vmem:[#allocation3 + $0x50] sm:$0xff]  ;;  %v41_v26 = vld [vmem:[#allocation3 + $0x48] sm:$0xff] }
   0xa   :  { %v552_v10 = vand.u32 4294901760, %v95_v5  ;;  %v555_v12 = vand.u32 4294901760, %v92_v11  ;;  %v89_v16 = vsel %vm51_vm0, %v43_v7, 0  ;;  %v86_v21 = vsel %vm51_vm0, %v42_v17, 0  ;;  %v40_v34 = vld [vmem:[#allocation3 + $0x40] sm:$0xff]  ;;  %v39_v41 = vld [vmem:[#allocation3 + $0x38] sm:$0xff] }
   0xb   :  { %104 = vmatpush.xpose.msra.mxu0 %v548_v8  ;;  %v559_v13 = vsub.f32 %v101_v3, %v548_v8  ;;  %v562_v14 = vsub.f32 %v98_v4, %v550_v9  ;;  %300 = vmatpush.xpose.msra.mxu3 %v548_v8  ;;  %v572_v20 = vand.u32 4294901760, %v89_v16  ;;  %v588_v28 = vand.u32 4294901760, %v86_v21  ;;  %v38_v48 = vld [vmem:[#allocation3 + $0x30] sm:$0xff]  ;;  %v37_v55 = vld [vmem:[#allocation3 + $0x28] sm:$0xff]  ;;  %v36_v62 = vld [vmem:[#allocation3 + $0x20] sm:$0xff]  ;;  %s452_s25 = sshll.u32 %s801_s3, 4  ;;  %s453_s25 = int_to_ptr.hbm [resolvable:$true] %s452_s25 }
   0xc   :  { %v565_v15 = vsub.f32 %v95_v5, %v552_v10  ;;  %v584_v25 = vsub.f32 %v92_v11, %v555_v12  ;;  %v83_v29 = vsel %vm51_vm0, %v41_v26, 0  ;;  %v80_v36 = vsel %vm51_vm0, %v40_v34, 0  ;;  %v35_v5 = vld [vmem:[#allocation3 + $0x18] sm:$0xff]  ;;  %v33_v34 = vld [vmem:[#allocation3 + $0x8] sm:$0xff] }
   0xd   :  { %v146_v18 = vand.u32 4294901760, %v559_v13  ;;  %v152_v19 = vand.u32 4294901760, %v562_v14  ;;  %247 = vmatpush.xpose.msra.mxu2 %v559_v13  ;;  %v597_v33 = vsub.f32 %v89_v16, %v572_v20  ;;  %v601_v35 = vand.u32 4294901760, %v83_v29 }
   0xe   :  { %v158_v24 = vand.u32 4294901760, %v565_v15  ;;  %v164_v32 = vand.u32 4294901760, %v584_v25  ;;  %v610_v40 = vsub.f32 %v86_v21, %v588_v28  ;;  %v617_v43 = vand.u32 4294901760, %v80_v36 }
   0xf   :  { %v147_v22 = vsub.f32 %v559_v13, %v146_v18  ;;  %106 = vmatpush.xpose.msra.mxu0 %v550_v9  ;;  %v153_v23 = vsub.f32 %v562_v14, %v152_v19  ;;  %302 = vmatpush.xpose.msra.mxu3 %v550_v9  ;;  %v170_v39 = vand.u32 4294901760, %v597_v33  ;;  %v615_v42 = vsub.f32 %v83_v29, %v601_v35  ;;  %v48_v13 = vld [vmem:[%s799_s1] sm:$0x1] }
  0x10   :  { %v159_v31 = vsub.f32 %v565_v15, %v158_v24  ;;  %v165_v38 = vsub.f32 %v584_v25, %v164_v32  ;;  %v176_v46 = vand.u32 4294901760, %v610_v40  ;;  %v77_v47 = vsel %vm51_vm0, %v39_v41, 0 }
  0x11   :  { %v148_v27 = vand.u32 4294901760, %v147_v22  ;;  %250 = vmatpush.xpose.msra.mxu2 %v562_v14  ;;  %v154_v30 = vand.u32 4294901760, %v153_v23  ;;  %v171_v45 = vsub.f32 %v597_v33, %v170_v39  ;;  %v182_v49 = vand.u32 4294901760, %v615_v42  ;;  %v34_v22 = vld [vmem:[#allocation3 + $0x10] sm:$0xff] }
  0x12   :  { %v160_v37 = vand.u32 4294901760, %v159_v31  ;;  %v166_v44 = vand.u32 4294901760, %v165_v38  ;;  %v629_v50 = vsub.f32 %v80_v36, %v617_v43  ;;  %v177_v52 = vsub.f32 %v610_v40, %v176_v46 }
  0x13   :  { %149 = vmatpush.xpose.msra.mxu1 %v148_v27  ;;  %108 = vmatpush.xpose.msra.mxu0 %v552_v10  ;;  %v172_v51 = vand.u32 4294901760, %v171_v45  ;;  %v635_v53 = vand.u32 4294901760, %v77_v47  ;;  %v74_v54 = vsel %vm51_vm0, %v38_v48, 0  ;;  %v183_v56 = vsub.f32 %v615_v42, %v182_v49 }
  0x14   :  { %304 = vmatpush.xpose.msra.mxu3 %v552_v10  ;;  %v188_v57 = vand.u32 4294901760, %v629_v50  ;;  %v178_v58 = vand.u32 4294901760, %v177_v52  ;;  %v648_v60 = vand.u32 4294901760, %v74_v54  ;;  %v71_v61 = vsel %vm51_vm0, %v37_v55, 0 }
  0x15   :  { %253 = vmatpush.xpose.msra.mxu2 %v565_v15  ;;  %v646_v59 = vsub.f32 %v77_v47, %v635_v53  ;;  %v184_v63 = vand.u32 4294901760, %v183_v56  ;;  %v661_v3 = vand.u32 4294901760, %v71_v61  ;;  %v68_v4 = vsel %vm51_vm0, %v36_v62, 0  ;;  %v32_v47 = vld [vmem:[#allocation3] sm:$0xff] }
  0x16   :  { %v189_v0 = vsub.f32 %v629_v50, %v188_v57  ;;  %v659_v2 = vsub.f32 %v74_v54, %v648_v60  ;;  %v666_v6 = vand.u32 4294901760, %v68_v4  ;;  %v65_v21 = vsel %vm51_vm0, %v35_v5, 0 }
  0x17   :  { %155 = vmatpush.xpose.msra.mxu1 %v154_v30  ;;  %110 = vmatpush.xpose.msra.mxu0 %v555_v12  ;;  %v194_v1 = vand.u32 4294901760, %v646_v59  ;;  %v674_v17 = vsub.f32 %v71_v61, %v661_v3  ;;  %v687_v30 = vand.u32 4294901760, %v65_v21  ;;  %v62_v31 = vsel %vm51_vm0, %v34_v22, 0 }
  0x18   :  { %306 = vmatpush.xpose.msra.mxu3 %v555_v12  ;;  %v190_v7 = vand.u32 4294901760, %v189_v0  ;;  %v200_v16 = vand.u32 4294901760, %v659_v2  ;;  %v680_v23 = vsub.f32 %v68_v4, %v666_v6  ;;  %v59_v45 = vsel %vm51_vm0, %v33_v34, 0 }
  0x19   :  { %256 = vmatpush.xpose.msra.mxu2 %v584_v25  ;;  %v195_v11 = vsub.f32 %v646_v59, %v194_v1  ;;  %v206_v29 = vand.u32 4294901760, %v674_v17  ;;  %v698_v41 = vsub.f32 %v65_v21, %v687_v30  ;;  %v713_v55 = vand.u32 4294901760, %v59_v45 }
  0x1a   :  { %v201_v27 = vsub.f32 %v659_v2, %v200_v16  ;;  %v212_v36 = vand.u32 4294901760, %v680_v23  ;;  %v56_v56 = vsel %vm51_vm0, %v32_v47, 0  ;;  %v53_v14 = vsel %vm51_vm0, %v48_v13, 0 }
  0x1b   :  { %161 = vmatpush.xpose.msra.mxu1 %v160_v37  ;;  %112 = vmatpush.xpose.msra.mxu0 %v572_v20  ;;  %v196_v26 = vand.u32 4294901760, %v195_v11  ;;  %v207_v38 = vsub.f32 %v674_v17, %v206_v29  ;;  %v218_v52 = vand.u32 4294901760, %v698_v41  ;;  %v726_v0 = vand.u32 4294901760, %v56_v56 }
  0x1c   :  { %308 = vmatpush.xpose.msra.mxu3 %v572_v20  ;;  %v202_v37 = vand.u32 4294901760, %v201_v27  ;;  %v213_v48 = vsub.f32 %v680_v23, %v212_v36 }
  0x1d   :  { %259 = vmatpush.xpose.msra.mxu2 %v597_v33  ;;  %v219_v61 = vsub.f32 %v698_v41, %v218_v52  ;;  %v235_v11 = vsub.f32 %v56_v56, %v726_v0 }
  0x1f   :  { %167 = vmatpush.xpose.msra.mxu1 %v166_v44  ;;  %114 = vmatpush.xpose.msra.mxu0 %v588_v28  ;;  %v700_v44 = vand.u32 4294901760, %v62_v31  ;;  %v220_v4 = vand.u32 4294901760, %v219_v61 }
  0x20   :  { %310 = vmatpush.xpose.msra.mxu3 %v588_v28 }
  0x21   :  { %262 = vmatpush.xpose.msra.mxu2 %v610_v40  ;;  %v711_v54 = vsub.f32 %v62_v31, %v700_v44 }
  0x23   :  { %173 = vmatpush.xpose.msra.mxu1 %v172_v51  ;;  %116 = vmatpush.xpose.msra.mxu0 %v601_v35  ;;  %v208_v51 = vand.u32 4294901760, %v207_v38  ;;  %v224_v62 = vand.u32 4294901760, %v711_v54 }
  0x24   :  { %312 = vmatpush.xpose.msra.mxu3 %v601_v35 }
  0x25   :  { %265 = vmatpush.xpose.msra.mxu2 %v615_v42  ;;  %v225_v5 = vsub.f32 %v711_v54, %v224_v62 }
  0x27   :  { %179 = vmatpush.xpose.msra.mxu1 %v178_v58  ;;  %118 = vmatpush.xpose.msra.mxu0 %v617_v43  ;;  %v214_v58 = vand.u32 4294901760, %v213_v48  ;;  %v226_v21 = vand.u32 4294901760, %v225_v5 }
  0x28   :  { %314 = vmatpush.xpose.msra.mxu3 %v617_v43 }
  0x29   :  { %268 = vmatpush.xpose.msra.mxu2 %v629_v50 }
  0x2b   :  { %185 = vmatpush.xpose.msra.mxu1 %v184_v63  ;;  %120 = vmatpush.xpose.msra.mxu0 %v635_v53  ;;  %v724_v63 = vsub.f32 %v59_v45, %v713_v55 }
  0x2c   :  { %316 = vmatpush.xpose.msra.mxu3 %v635_v53 }
  0x2d   :  { %271 = vmatpush.xpose.msra.mxu2 %v646_v59 }
  0x2f   :  { %191 = vmatpush.xpose.msra.mxu1 %v190_v7  ;;  %122 = vmatpush.xpose.msra.mxu0 %v648_v60  ;;  %v230_v7 = vand.u32 4294901760, %v724_v63 }
  0x30   :  { %318 = vmatpush.xpose.msra.mxu3 %v648_v60 }
  0x31   :  { %274 = vmatpush.xpose.msra.mxu2 %v659_v2  ;;  %v231_v22 = vsub.f32 %v724_v63, %v230_v7 }
  0x33   :  { %197 = vmatpush.xpose.msra.mxu1 %v196_v26  ;;  %124 = vmatpush.xpose.msra.mxu0 %v661_v3  ;;  %v236_v26 = vand.u32 4294901760, %v235_v11  ;;  %v232_v27 = vand.u32 4294901760, %v231_v22 }
  0x34   :  { %320 = vmatpush.xpose.msra.mxu3 %v661_v3 }
  0x35   :  { %277 = vmatpush.xpose.msra.mxu2 %v674_v17  ;;  %v237_v31 = vsub.f32 %v235_v11, %v236_v26 }
  0x37   :  { %203 = vmatpush.xpose.msra.mxu1 %v202_v37  ;;  %126 = vmatpush.xpose.msra.mxu0 %v666_v6  ;;  %v238_v34 = vand.u32 4294901760, %v237_v31 }
  0x38   :  { %322 = vmatpush.xpose.msra.mxu3 %v666_v6 }
  0x39   :  { %280 = vmatpush.xpose.msra.mxu2 %v680_v23 }
  0x3b   :  { %209 = vmatpush.xpose.msra.mxu1 %v208_v51  ;;  %128 = vmatpush.xpose.msra.mxu0 %v687_v30 }
  0x3c   :  { %324 = vmatpush.xpose.msra.mxu3 %v687_v30 }
  0x3d   :  { %283 = vmatpush.xpose.msra.mxu2 %v698_v41 }
  0x3f   :  { %215 = vmatpush.xpose.msra.mxu1 %v214_v58  ;;  %130 = vmatpush.xpose.msra.mxu0 %v700_v44 }
  0x40   :  { %326 = vmatpush.xpose.msra.mxu3 %v700_v44 }
  0x41   :  { %286 = vmatpush.xpose.msra.mxu2 %v711_v54 }
  0x43   :  { %221 = vmatpush.xpose.msra.mxu1 %v220_v4  ;;  %132 = vmatpush.xpose.msra.mxu0 %v713_v55 }
  0x44   :  { %328 = vmatpush.xpose.msra.mxu3 %v713_v55 }
  0x45   :  { %289 = vmatpush.xpose.msra.mxu2 %v724_v63 }
  0x47   :  { %227 = vmatpush.xpose.msra.mxu1 %v226_v21  ;;  %134 = vmatpush.xpose.msra.mxu0 %v726_v0 }
  0x48   :  { %330 = vmatpush.xpose.msra.mxu3 %v726_v0 }
  0x49   :  { %292 = vmatpush.xpose.msra.mxu2 %v235_v11 }
  0x4b   :  { %341 = vmatpush.xpose.msrb.mxu0 %v146_v18  ;;  %233 = vmatpush.xpose.msra.mxu1 %v232_v27 }
  0x4f   :  { %345 = vmatpush.xpose.msrb.mxu0 %v152_v19  ;;  %239 = vmatpush.xpose.msra.mxu1 %v238_v34 }
  0x53   :  { %408 = vmatpush.xpose.msrb.mxu1 %v548_v8  ;;  %349 = vmatpush.xpose.msrb.mxu0 %v158_v24  ;;  %v135_v8 = vand.u32 4294901760, %v53_v14 }
  0x55   :  { %241 = vmatmul.f32.vlgmr.msra.gmra.mxu1 %v135_v8 }
  0x57   :  { %410 = vmatpush.xpose.msrb.mxu1 %v550_v9  ;;  %353 = vmatpush.xpose.msrb.mxu0 %v164_v32  ;;  %v136_v9 = vsub.f32 %v53_v14, %v135_v8 }
  0x59   :  { %295 = vmatmul.f32.vlgmr.msra.gmra.mxu2 %v136_v9  ;;  %v137_v15 = vand.u32 4294901760, %v136_v9 }
  0x5b   :  { %412 = vmatpush.xpose.msrb.mxu1 %v552_v10  ;;  %357 = vmatpush.xpose.msrb.mxu0 %v170_v39  ;;  %v138_v10 = vsub.f32 %v136_v9, %v137_v15 }
  0x5c   :  { %334 = vmatmul.f32.vlgmr.msra.gmra.mxu3 %v137_v15 }
  0x5d   :  { %v139_v18 = vand.u32 4294901760, %v138_v10 }
  0x5f   :  { %414 = vmatpush.xpose.msrb.mxu1 %v555_v12  ;;  %361 = vmatpush.xpose.msrb.mxu0 %v176_v46  ;;  %v50_v12 = vstv %s800_s2 }
  0x60   :  { %140 = vmatmul.f32.vlgmr.msra.gmra.mxu0 %v139_v18 }
  0x63   :  { %416 = vmatpush.xpose.msrb.mxu1 %v572_v20  ;;  %365 = vmatpush.xpose.msrb.mxu0 %v182_v49 }
  0x67   :  { %418 = vmatpush.xpose.msrb.mxu1 %v588_v28  ;;  %369 = vmatpush.xpose.msrb.mxu0 %v188_v57 }
  0x6b   :  { %420 = vmatpush.xpose.msrb.mxu1 %v601_v35  ;;  %373 = vmatpush.xpose.msrb.mxu0 %v194_v1 }
  0x6f   :  { %422 = vmatpush.xpose.msrb.mxu1 %v617_v43  ;;  %377 = vmatpush.xpose.msrb.mxu0 %v200_v16 }
  0x73   :  { %424 = vmatpush.xpose.msrb.mxu1 %v635_v53  ;;  %381 = vmatpush.xpose.msrb.mxu0 %v206_v29 }
  0x77   :  { %426 = vmatpush.xpose.msrb.mxu1 %v648_v60  ;;  %385 = vmatpush.xpose.msrb.mxu0 %v212_v36 }
  0x7b   :  { %428 = vmatpush.xpose.msrb.mxu1 %v661_v3  ;;  %389 = vmatpush.xpose.msrb.mxu0 %v218_v52 }
  0x7f   :  { %430 = vmatpush.xpose.msrb.mxu1 %v666_v6  ;;  %393 = vmatpush.xpose.msrb.mxu0 %v224_v62 }
  0x83   :  { %432 = vmatpush.xpose.msrb.mxu1 %v687_v30  ;;  %397 = vmatpush.xpose.msrb.mxu0 %v230_v7 }
  0x87   :  { %434 = vmatpush.xpose.msrb.mxu1 %v700_v44  ;;  %401 = vmatpush.xpose.msrb.mxu0 %v236_v26 }
  0x8a   :  { %403 = vmatmul.f32.vlgmr.msrb.gmra.mxu0 %v135_v8 }
  0x8b   :  { %436 = vmatpush.xpose.msrb.mxu1 %v713_v55 }
  0x8f   :  { %438 = vmatpush.xpose.msrb.mxu1 %v726_v0 }
  0x92   :  { %440 = vmatmul.f32.vlgmr.msrb.gmra.mxu1 %v135_v8 }
  0xd2   :  { %v242_v24 = vpop.f32.mrf.mxu1 }
  0xdc   :  { %v296_v28 = vpop.f32.mrf.mxu2 }
  0xdd   :  { %v141_v19 = vpop.f32.mrf.mxu0 }
  0xde   :  { %v142_v20 = vadd.f32 %v141_v19, %v50_v12 }
  0xdf   :  { %v335_v33 = vpop.f32.mrf.mxu3 }
  0xe0   :  { %v243_v25 = vadd.f32 %v242_v24, %v142_v20 }
  0xe2   :  { %v297_v32 = vadd.f32 %v296_v28, %v243_v25 }
  0xe4   :  { %v336_v35 = vadd.f32 %v335_v33, %v297_v32 }
 0x107   :  { %v404_v39 = vpop.f32.mrf.mxu0 }
 0x108   :  { %v405_v40 = vadd.f32 %v404_v39, %v336_v35 }
 0x10f   :  { %v441_v42 = vpop.f32.mrf.mxu1 }
 0x110   :  { %v442_v43 = vadd.f32 %v441_v42, %v405_v40 }
 0x112   :  { %444 = vst [vmem:[#allocation6] sm:$0x1] %v442_v43 }
 0x113   :  { %455 = dma.vmem_to_hbm [thread:$0]  %s451_s22, 16, %s453_s25, [#allocation5]  }
 0x114   :  { %516 = dma.done.wait [#allocation5], 16  }
 0x115   :  { %517 = vsyncadd [#allocation5], 4294967280 }
 0x116   :  { %460 = vsyncpa [#allocation4], 1 }
 0x117   :  { %461 = vsyncpa [#allocation5], 1 }

</bundles_post_ra>
